<compile_context>
chip_gen: v7x
topology: tpu7x:2x2x1
jax: 0.10.0
libtpu: 0.0.40
codegen_flags: <defaults>
</compile_context>

<pallas_src>
import jax
import jax.numpy as jnp
import numpy as np
from jax.experimental import pallas as pl
from jax.experimental.pallas import tpu as pltpu


def fraud_cnn_kernel(x_ref, cw_ref, cb_ref, w1_ref, b1_ref, w2_ref, b2_ref, out_ref):
    """Forward pass for one batch tile.

    x_ref  : (tb, L+K-1, C) bf16   causally padded, channels-last activations
    cw_ref : (K, C, F)      bf16   conv1 weight, cw[k, c, f] = conv_w[f, c, k]
    cb_ref : (1, F)         f32    conv1 bias
    w1_ref : (F, H) bf16    b1_ref : (1, H) f32    fc1
    w2_ref : (H, 2) bf16    b2_ref : (1, 2) f32    fc2
    out_ref: (tb, 2)        f32    softmax probabilities
    """
    K = cw_ref.shape[0]
    Lp = x_ref.shape[1]
    L = Lp - K + 1

    x = x_ref[...]                                                  # (tb, Lp, C) bf16

    # Causal Conv1d as K shifted MXU dots accumulated in f32 (in-kernel im2col).
    conv = jnp.einsum('blc,cf->blf', x[:, 0:L, :], cw_ref[0],
                      preferred_element_type=jnp.float32)           # (tb, L, F)
    for k in range(1, K):
        conv = conv + jnp.einsum('blc,cf->blf', x[:, k:k + L, :], cw_ref[k],
                                 preferred_element_type=jnp.float32)

    # MaxPool1d(seq_len); conv bias added after the pool (constant shift commutes with max).
    pooled = jnp.max(conv, axis=1) + cb_ref[...]                    # (tb, F) f32

    # fc1 -> ReLU   (Dropout p=0 is identity, omitted)
    h = jnp.dot(pooled.astype(w1_ref.dtype), w1_ref[...],
                preferred_element_type=jnp.float32) + b1_ref[...]
    h = jnp.maximum(h, 0.0)

    # fc2 -> softmax(dim=1)
    logits = jnp.dot(h.astype(w2_ref.dtype), w2_ref[...],
                     preferred_element_type=jnp.float32) + b2_ref[...]
    m = jnp.max(logits, axis=1, keepdims=True)
    e = jnp.exp(logits - m)
    denom = jnp.sum(e, axis=1, keepdims=True)
    out_ref[...] = (e * pl.reciprocal(denom, approx=True)).astype(out_ref.dtype)


def prepare_params(params):
    """One-time ("model load") layout/dtype transforms of the PyTorch-style params."""
    conv_w, conv_b, fc1_w, fc1_b, fc2_w, fc2_b = params
    F, C, K = conv_w.shape
    H = fc1_w.shape[0]
    cw = jnp.transpose(conv_w, (2, 1, 0)).astype(jnp.bfloat16)       # (K, C, F)
    cb = conv_b.reshape(1, F).astype(jnp.float32)
    w1 = fc1_w.T.astype(jnp.bfloat16)                                # (F, H)
    b1 = fc1_b.reshape(1, H).astype(jnp.float32)
    w2 = fc2_w.T.astype(jnp.bfloat16)                                # (H, 2)
    b2 = fc2_b.reshape(1, 2).astype(jnp.float32)
    return (cw, cb, w1, b1, w2, b2)


def _pick_batch_tile(batch, seq_len, cap_rows=1024):
    """Largest batch tile that divides `batch`, keeps tb*L under cap_rows (VMEM /
    vreg pressure for the f32 conv intermediate) and is a multiple of 8 whenever
    it is a proper sub-tile (Mosaic (8,128) rule on the (tb, 2) output block)."""
    if batch * seq_len <= cap_rows:
        return batch
    cap = max(8, cap_rows // max(seq_len, 1))
    for tb in range(min(cap, batch), 7, -1):
        if batch % tb == 0 and tb % 8 == 0:
            return tb
    return batch


def fraud_cnn_forward(x_ncl, prepared, *, batch_tile=None):
    """x_ncl: (B, num_features, seq_len), same convention as torch Conv1d."""
    cw, cb, w1, b1, w2, b2 = prepared
    B, C, L = x_ncl.shape
    K = cw.shape[0]

    # Per-call input prep (1x HBM traffic): channels-last + causal left pad + bf16.
    # (ConstantPad1d((K-1, 0), 0) followed by "VALID" Conv1d == causal conv.)
    x_blc = jnp.transpose(x_ncl, (0, 2, 1))                           # (B, L, C)
    x_pad = jnp.pad(x_blc, ((0, 0), (K - 1, 0), (0, 0))).astype(jnp.bfloat16)  # (B, L+K-1, C)

    tb = _pick_batch_tile(B, L) if batch_tile is None else batch_tile
    assert B % tb == 0, "batch must be divisible by the batch tile"
    grid = (B // tb,)
    if grid[0] > 1:
        assert tb % 8 == 0, "sub-batch tiles must be a multiple of 8"

    def call(single_buffer_weights):
        def const_spec(shape):
            ndim = len(shape)
            if single_buffer_weights:
                # Constant across the grid -> single buffer, pure VMEM savings.
                return pl.BlockSpec(shape, lambda i: (0,) * ndim,
                                    pipeline_mode=pl.Buffered(1))
            return pl.BlockSpec(shape, lambda i: (0,) * ndim)

        return pl.pallas_call(
            fraud_cnn_kernel,
            out_shape=jax.ShapeDtypeStruct((B, 2), jnp.float32),
            grid=grid,
            in_specs=[
                pl.BlockSpec((tb, L + K - 1, C), lambda i: (i, 0, 0)),  # activation tile
                const_spec(cw.shape), const_spec(cb.shape),
                const_spec(w1.shape), const_spec(b1.shape),
                const_spec(w2.shape), const_spec(b2.shape),
            ],
            out_specs=pl.BlockSpec((tb, 2), lambda i: (i, 0)),
            compiler_params=pltpu.CompilerParams(
                dimension_semantics=("parallel",),
                vmem_limit_bytes=32 * 1024 * 1024),
        )(x_pad, cw, cb, w1, b1, w2, b2)

    if hasattr(pl, "Buffered"):
        try:
            # Block inside the try so any lowering/runtime issue with Buffered(1)
            # surfaces here and triggers the double-buffered fallback.
            return jax.block_until_ready(call(True))
        except Exception:
            pass
    return call(False)


def fraud_cnn_reference(x_ncl, params, filter_size=2):
    """Pure-JAX f32 reference matching the PyTorch forward semantics."""
    conv_w, conv_b, fc1_w, fc1_b, fc2_w, fc2_b = params
    K = filter_size
    x_pad = jnp.pad(x_ncl, ((0, 0), (0, 0), (K - 1, 0)))
    conv = jax.lax.conv_general_dilated(
        x_pad, conv_w, window_strides=(1,), padding="VALID",
        dimension_numbers=("NCH", "OIH", "NCH"))
    conv = conv + conv_b[None, :, None]
    pooled = jnp.max(conv, axis=2)                                   # MaxPool1d(seq_len)
    h = jnp.maximum(pooled @ fc1_w.T + fc1_b, 0.0)
    logits = h @ fc2_w.T + fc2_b
    return jax.nn.softmax(logits, axis=1)


def init_params(key, num_features, num_filters, filter_size, hidden_size):
    ks = jax.random.split(key, 6)

    def u(k, shape, fan_in):
        bound = 1.0 / np.sqrt(fan_in)
        return jax.random.uniform(k, shape, jnp.float32, -bound, bound)

    conv_w = u(ks[0], (num_filters, num_features, filter_size), num_features * filter_size)
    conv_b = u(ks[1], (num_filters,), num_features * filter_size)
    fc1_w = u(ks[2], (hidden_size, num_filters), num_filters)
    fc1_b = u(ks[3], (hidden_size,), num_filters)
    fc2_w = u(ks[4], (2, hidden_size), hidden_size)
    fc2_b = u(ks[5], (2,), hidden_size)
    return (conv_w, conv_b, fc1_w, fc1_b, fc2_w, fc2_b)


if __name__ == "__main__":
    # Small, forward-consistent shapes.
    B, num_features, seq_len = 8, 4, 8
    num_filters, hidden_size, filter_size = 32, 32, 2

    key = jax.random.PRNGKey(0)
    k_x, k_p = jax.random.split(key)
    x = jax.random.normal(k_x, (B, num_features, seq_len), jnp.float32)  # NCL
    params = init_params(k_p, num_features, num_filters, filter_size, hidden_size)

    # One-time weight layout/dtype prep ("model load"), reused across forward calls.
    prepared = prepare_params(params)

    out = fraud_cnn_forward(x, prepared)
    out = jax.block_until_ready(out)

    ref = jax.block_until_ready(fraud_cnn_reference(x, params, filter_size=filter_size))
    assert out.shape == (B, 2), out.shape
    # bf16 matmul operands + approx reciprocal -> loosened tolerance vs the f32 reference.
    np.testing.assert_allclose(np.asarray(out), np.asarray(ref), rtol=2e-2, atol=2e-2)
    # Softmax rows sum to (approximately) 1.
    np.testing.assert_allclose(np.asarray(out).sum(axis=1), np.ones(B), rtol=1e-2, atol=1e-2)

    print("KERNEL_OK")
</pallas_src>

<mosaic_0001>
module attributes {stable_mosaic.version = 11 : i64} {
  func.func @fraud_cnn_kernel(%arg0: i32, %arg1: memref<8x9x4xbf16, #tpu.memory_space<vmem>>, %arg2: memref<2x4x32xbf16, #tpu.memory_space<vmem>>, %arg3: memref<1x32xf32, #tpu.memory_space<vmem>>, %arg4: memref<32x32xbf16, #tpu.memory_space<vmem>>, %arg5: memref<1x32xf32, #tpu.memory_space<vmem>>, %arg6: memref<32x2xbf16, #tpu.memory_space<vmem>>, %arg7: memref<1x2xf32, #tpu.memory_space<vmem>>, %arg8: memref<8x2xf32, #tpu.memory_space<vmem>>) attributes {dimension_semantics = [#tpu.dimension_semantics<parallel>], iteration_bounds = array<i64: 1>, scalar_prefetch = 0 : i64, scratch_operands = 0 : i64, tpu.core_type = #tpu.core_type<tc>, window_params = [{transform_indices = @transform_0, window_bounds = array<i64: 8, 9, 4>}, {pipeline_mode = #tpu.pipeline_mode<synchronous>, transform_indices = @transform_1, window_bounds = array<i64: 2, 4, 32>}, {pipeline_mode = #tpu.pipeline_mode<synchronous>, transform_indices = @transform_2, window_bounds = array<i64: 1, 32>}, {pipeline_mode = #tpu.pipeline_mode<synchronous>, transform_indices = @transform_3, window_bounds = array<i64: 32, 32>}, {pipeline_mode = #tpu.pipeline_mode<synchronous>, transform_indices = @transform_4, window_bounds = array<i64: 1, 32>}, {pipeline_mode = #tpu.pipeline_mode<synchronous>, transform_indices = @transform_5, window_bounds = array<i64: 32, 2>}, {pipeline_mode = #tpu.pipeline_mode<synchronous>, transform_indices = @transform_6, window_bounds = array<i64: 1, 2>}, {transform_indices = @transform_7, window_bounds = array<i64: 8, 2>}]} {
    %c0 = arith.constant 0 : index
    %c0_0 = arith.constant 0 : index
    %c0_1 = arith.constant 0 : index
    %0 = vector.load %arg1[%c0, %c0_0, %c0_1] : memref<8x9x4xbf16, #tpu.memory_space<vmem>>, vector<8x9x4xbf16>
    %1 = vector.extract_strided_slice %0 {offsets = [0, 0, 0], sizes = [8, 8, 4], strides = [1, 1, 1]} : vector<8x9x4xbf16> to vector<8x8x4xbf16>
    %c0_2 = arith.constant 0 : index
    %c0_3 = arith.constant 0 : index
    %c0_4 = arith.constant 0 : index
    %2 = vector.load %arg2[%c0_2, %c0_3, %c0_4] : memref<2x4x32xbf16, #tpu.memory_space<vmem>>, vector<1x4x32xbf16>
    %3 = vector.shape_cast %2 : vector<1x4x32xbf16> to vector<4x32xbf16>
    "tpu.trace_start"() <{level = 10 : i32, message = "blc,cf->blf"}> : () -> ()
    %cst = arith.constant dense<0.000000e+00> : vector<8x8x32xf32>
    %4 = tpu.matmul %1, %3, %cst {dimension_numbers = #tpu.dot_dimension_numbers<[2], [0], [0, 1], [1], [0, 0, 0, 1, 1, 1], [], []>} : vector<8x8x4xbf16>, vector<4x32xbf16>, vector<8x8x32xf32> -> vector<8x8x32xf32>
    "tpu.trace_stop"() : () -> ()
    %5 = vector.extract_strided_slice %0 {offsets = [0, 1, 0], sizes = [8, 8, 4], strides = [1, 1, 1]} : vector<8x9x4xbf16> to vector<8x8x4xbf16>
    %c1 = arith.constant 1 : index
    %c0_5 = arith.constant 0 : index
    %c0_6 = arith.constant 0 : index
    %6 = vector.load %arg2[%c1, %c0_5, %c0_6] : memref<2x4x32xbf16, #tpu.memory_space<vmem>>, vector<1x4x32xbf16>
    %7 = vector.shape_cast %6 : vector<1x4x32xbf16> to vector<4x32xbf16>
    "tpu.trace_start"() <{level = 10 : i32, message = "blc,cf->blf"}> : () -> ()
    %cst_7 = arith.constant dense<0.000000e+00> : vector<8x8x32xf32>
    %8 = tpu.matmul %5, %7, %cst_7 {dimension_numbers = #tpu.dot_dimension_numbers<[2], [0], [0, 1], [1], [0, 0, 0, 1, 1, 1], [], []>} : vector<8x8x4xbf16>, vector<4x32xbf16>, vector<8x8x32xf32> -> vector<8x8x32xf32>
    "tpu.trace_stop"() : () -> ()
    %9 = arith.addf %4, %8 : vector<8x8x32xf32>
    %cst_8 = arith.constant dense<0xFF800000> : vector<8x32xf32>
    %10 = vector.multi_reduction <maximumf>, %9, %cst_8 [1] : vector<8x8x32xf32> to vector<8x32xf32>
    %c0_9 = arith.constant 0 : index
    %c0_10 = arith.constant 0 : index
    %11 = vector.load %arg3[%c0_9, %c0_10] : memref<1x32xf32, #tpu.memory_space<vmem>>, vector<1x32xf32>
    %12 = vector.broadcast %11 : vector<1x32xf32> to vector<8x32xf32>
    %13 = arith.addf %10, %12 : vector<8x32xf32>
    %14 = arith.truncf %13 : vector<8x32xf32> to vector<8x32xbf16>
    %c0_11 = arith.constant 0 : index
    %c0_12 = arith.constant 0 : index
    %15 = vector.load %arg4[%c0_11, %c0_12] : memref<32x32xbf16, #tpu.memory_space<vmem>>, vector<32x32xbf16>
    %cst_13 = arith.constant dense<0.000000e+00> : vector<8x32xf32>
    %16 = tpu.matmul %14, %15, %cst_13 {dimension_numbers = #tpu.dot_dimension_numbers<[1], [0], [0], [1], [0, 0, 1, 1], [], []>} : vector<8x32xbf16>, vector<32x32xbf16>, vector<8x32xf32> -> vector<8x32xf32>
    %c0_14 = arith.constant 0 : index
    %c0_15 = arith.constant 0 : index
    %17 = vector.load %arg5[%c0_14, %c0_15] : memref<1x32xf32, #tpu.memory_space<vmem>>, vector<1x32xf32>
    %18 = vector.broadcast %17 : vector<1x32xf32> to vector<8x32xf32>
    %19 = arith.addf %16, %18 : vector<8x32xf32>
    %cst_16 = arith.constant 0.000000e+00 : f32
    %20 = vector.broadcast %cst_16 : f32 to vector<8x32xf32>
    %21 = arith.maximumf %19, %20 : vector<8x32xf32>
    %22 = arith.truncf %21 : vector<8x32xf32> to vector<8x32xbf16>
    %c0_17 = arith.constant 0 : index
    %c0_18 = arith.constant 0 : index
    %23 = vector.load %arg6[%c0_17, %c0_18] : memref<32x2xbf16, #tpu.memory_space<vmem>>, vector<32x2xbf16>
    %cst_19 = arith.constant dense<0.000000e+00> : vector<8x2xf32>
    %24 = tpu.matmul %22, %23, %cst_19 {dimension_numbers = #tpu.dot_dimension_numbers<[1], [0], [0], [1], [0, 0, 1, 1], [], []>} : vector<8x32xbf16>, vector<32x2xbf16>, vector<8x2xf32> -> vector<8x2xf32>
    %c0_20 = arith.constant 0 : index
    %c0_21 = arith.constant 0 : index
    %25 = vector.load %arg7[%c0_20, %c0_21] : memref<1x2xf32, #tpu.memory_space<vmem>>, vector<1x2xf32>
    %26 = vector.broadcast %25 : vector<1x2xf32> to vector<8x2xf32>
    %27 = arith.addf %24, %26 : vector<8x2xf32>
    %cst_22 = arith.constant dense<0xFF800000> : vector<8xf32>
    %28 = vector.multi_reduction <maximumf>, %27, %cst_22 [1] : vector<8x2xf32> to vector<8xf32>
    %29 = vector.shape_cast %28 : vector<8xf32> to vector<8x1xf32>
    %30 = vector.broadcast %29 : vector<8x1xf32> to vector<8x2xf32>
    %31 = arith.subf %27, %30 : vector<8x2xf32>
    %32 = math.exp %31 : vector<8x2xf32>
    %cst_23 = arith.constant dense<0.000000e+00> : vector<8xf32>
    %33 = vector.multi_reduction <add>, %32, %cst_23 [1] : vector<8x2xf32> to vector<8xf32>
    %34 = vector.shape_cast %33 : vector<8xf32> to vector<8x1xf32>
    %35 = tpu.reciprocal %34 {approx = true} : vector<8x1xf32> -> vector<8x1xf32>
    %36 = vector.broadcast %35 : vector<8x1xf32> to vector<8x2xf32>
    %37 = arith.mulf %32, %36 : vector<8x2xf32>
    %c0_24 = arith.constant 0 : index
    %c0_25 = arith.constant 0 : index
    %38 = vector.load %arg8[%c0_24, %c0_25] : memref<8x2xf32, #tpu.memory_space<vmem>>, vector<8x2xf32>
    tpu.vector_store %arg8[%c0_24, %c0_25], %37 {strides = array<i32>} : memref<8x2xf32, #tpu.memory_space<vmem>>, vector<8x2xf32>,
    return
  }
  func.func @transform_0(%arg0: i32) -> (i32, i32, i32) {
    %c0_i32 = arith.constant 0 : i32
    %c0_i32_0 = arith.constant 0 : i32
    %c0_i32_1 = arith.constant 0 : i32
    return %arg0, %c0_i32, %c0_i32_0 : i32, i32, i32
  }
  func.func @transform_1(%arg0: i32) -> (i32, i32, i32) {
    %c0_i32 = arith.constant 0 : i32
    %c0_i32_0 = arith.constant 0 : i32
    %c0_i32_1 = arith.constant 0 : i32
    %c0_i32_2 = arith.constant 0 : i32
    return %c0_i32, %c0_i32_0, %c0_i32_1 : i32, i32, i32
  }
  func.func @transform_2(%arg0: i32) -> (i32, i32) {
    %c0_i32 = arith.constant 0 : i32
    %c0_i32_0 = arith.constant 0 : i32
    %c0_i32_1 = arith.constant 0 : i32
    return %c0_i32, %c0_i32_0 : i32, i32
  }
  func.func @transform_3(%arg0: i32) -> (i32, i32) {
    %c0_i32 = arith.constant 0 : i32
    %c0_i32_0 = arith.constant 0 : i32
    %c0_i32_1 = arith.constant 0 : i32
    return %c0_i32, %c0_i32_0 : i32, i32
  }
  func.func @transform_4(%arg0: i32) -> (i32, i32) {
    %c0_i32 = arith.constant 0 : i32
    %c0_i32_0 = arith.constant 0 : i32
    %c0_i32_1 = arith.constant 0 : i32
    return %c0_i32, %c0_i32_0 : i32, i32
  }
  func.func @transform_5(%arg0: i32) -> (i32, i32) {
    %c0_i32 = arith.constant 0 : i32
    %c0_i32_0 = arith.constant 0 : i32
    %c0_i32_1 = arith.constant 0 : i32
    return %c0_i32, %c0_i32_0 : i32, i32
  }
  func.func @transform_6(%arg0: i32) -> (i32, i32) {
    %c0_i32 = arith.constant 0 : i32
    %c0_i32_0 = arith.constant 0 : i32
    %c0_i32_1 = arith.constant 0 : i32
    return %c0_i32, %c0_i32_0 : i32, i32
  }
  func.func @transform_7(%arg0: i32) -> (i32, i32) {
    %c0_i32 = arith.constant 0 : i32
    %c0_i32_0 = arith.constant 0 : i32
    return %arg0, %c0_i32 : i32, i32
  }
}

module attributes {stable_mosaic.version = 11 : i64} {
  func.func @fraud_cnn_kernel(%arg0: i32, %arg1: memref<8x9x4xbf16, #tpu.memory_space<vmem>>, %arg2: memref<2x4x32xbf16, #tpu.memory_space<vmem>>, %arg3: memref<1x32xf32, #tpu.memory_space<vmem>>, %arg4: memref<32x32xbf16, #tpu.memory_space<vmem>>, %arg5: memref<1x32xf32, #tpu.memory_space<vmem>>, %arg6: memref<32x2xbf16, #tpu.memory_space<vmem>>, %arg7: memref<1x2xf32, #tpu.memory_space<vmem>>, %arg8: memref<8x2xf32, #tpu.memory_space<vmem>>) attributes {dimension_semantics = [#tpu.dimension_semantics<parallel>], iteration_bounds = array<i64: 1>, scalar_prefetch = 0 : i64, scratch_operands = 0 : i64, tpu.core_type = #tpu.core_type<tc>, window_params = [{transform_indices = @transform_0, window_bounds = array<i64: 8, 9, 4>}, {pipeline_mode = #tpu.pipeline_mode<synchronous>, transform_indices = @transform_1, window_bounds = array<i64: 2, 4, 32>}, {pipeline_mode = #tpu.pipeline_mode<synchronous>, transform_indices = @transform_2, window_bounds = array<i64: 1, 32>}, {pipeline_mode = #tpu.pipeline_mode<synchronous>, transform_indices = @transform_3, window_bounds = array<i64: 32, 32>}, {pipeline_mode = #tpu.pipeline_mode<synchronous>, transform_indices = @transform_4, window_bounds = array<i64: 1, 32>}, {pipeline_mode = #tpu.pipeline_mode<synchronous>, transform_indices = @transform_5, window_bounds = array<i64: 32, 2>}, {pipeline_mode = #tpu.pipeline_mode<synchronous>, transform_indices = @transform_6, window_bounds = array<i64: 1, 2>}, {transform_indices = @transform_7, window_bounds = array<i64: 8, 2>}]} {
    %c0 = arith.constant 0 : index
    %c0_0 = arith.constant 0 : index
    %c0_1 = arith.constant 0 : index
    %0 = vector.load %arg1[%c0, %c0_0, %c0_1] : memref<8x9x4xbf16, #tpu.memory_space<vmem>>, vector<8x9x4xbf16>
    %1 = vector.extract_strided_slice %0 {offsets = [0, 0, 0], sizes = [8, 8, 4], strides = [1, 1, 1]} : vector<8x9x4xbf16> to vector<8x8x4xbf16>
    %c0_2 = arith.constant 0 : index
    %c0_3 = arith.constant 0 : index
    %c0_4 = arith.constant 0 : index
    %2 = vector.load %arg2[%c0_2, %c0_3, %c0_4] : memref<2x4x32xbf16, #tpu.memory_space<vmem>>, vector<1x4x32xbf16>
    %3 = vector.shape_cast %2 : vector<1x4x32xbf16> to vector<4x32xbf16>
    "tpu.trace_start"() <{level = 10 : i32, message = "blc,cf->blf"}> : () -> ()
    %cst = arith.constant dense<0.000000e+00> : vector<8x8x32xf32>
    %4 = tpu.matmul %1, %3, %cst {dimension_numbers = #tpu.dot_dimension_numbers<[2], [0], [0, 1], [1], [0, 0, 0, 1, 1, 1], [], []>} : vector<8x8x4xbf16>, vector<4x32xbf16>, vector<8x8x32xf32> -> vector<8x8x32xf32>
    "tpu.trace_stop"() : () -> ()
    %5 = vector.extract_strided_slice %0 {offsets = [0, 1, 0], sizes = [8, 8, 4], strides = [1, 1, 1]} : vector<8x9x4xbf16> to vector<8x8x4xbf16>
    %c1 = arith.constant 1 : index
    %c0_5 = arith.constant 0 : index
    %c0_6 = arith.constant 0 : index
    %6 = vector.load %arg2[%c1, %c0_5, %c0_6] : memref<2x4x32xbf16, #tpu.memory_space<vmem>>, vector<1x4x32xbf16>
    %7 = vector.shape_cast %6 : vector<1x4x32xbf16> to vector<4x32xbf16>
    "tpu.trace_start"() <{level = 10 : i32, message = "blc,cf->blf"}> : () -> ()
    %cst_7 = arith.constant dense<0.000000e+00> : vector<8x8x32xf32>
    %8 = tpu.matmul %5, %7, %cst_7 {dimension_numbers = #tpu.dot_dimension_numbers<[2], [0], [0, 1], [1], [0, 0, 0, 1, 1, 1], [], []>} : vector<8x8x4xbf16>, vector<4x32xbf16>, vector<8x8x32xf32> -> vector<8x8x32xf32>
    "tpu.trace_stop"() : () -> ()
    %9 = arith.addf %4, %8 : vector<8x8x32xf32>
    %cst_8 = arith.constant dense<0xFF800000> : vector<8x32xf32>
    %10 = vector.multi_reduction <maximumf>, %9, %cst_8 [1] : vector<8x8x32xf32> to vector<8x32xf32>
    %c0_9 = arith.constant 0 : index
    %c0_10 = arith.constant 0 : index
    %11 = vector.load %arg3[%c0_9, %c0_10] : memref<1x32xf32, #tpu.memory_space<vmem>>, vector<1x32xf32>
    %12 = vector.broadcast %11 : vector<1x32xf32> to vector<8x32xf32>
    %13 = arith.addf %10, %12 : vector<8x32xf32>
    %14 = arith.truncf %13 : vector<8x32xf32> to vector<8x32xbf16>
    %c0_11 = arith.constant 0 : index
    %c0_12 = arith.constant 0 : index
    %15 = vector.load %arg4[%c0_11, %c0_12] : memref<32x32xbf16, #tpu.memory_space<vmem>>, vector<32x32xbf16>
    %cst_13 = arith.constant dense<0.000000e+00> : vector<8x32xf32>
    %16 = tpu.matmul %14, %15, %cst_13 {dimension_numbers = #tpu.dot_dimension_numbers<[1], [0], [0], [1], [0, 0, 1, 1], [], []>} : vector<8x32xbf16>, vector<32x32xbf16>, vector<8x32xf32> -> vector<8x32xf32>
    %c0_14 = arith.constant 0 : index
    %c0_15 = arith.constant 0 : index
    %17 = vector.load %arg5[%c0_14, %c0_15] : memref<1x32xf32, #tpu.memory_space<vmem>>, vector<1x32xf32>
    %18 = vector.broadcast %17 : vector<1x32xf32> to vector<8x32xf32>
    %19 = arith.addf %16, %18 : vector<8x32xf32>
    %cst_16 = arith.constant 0.000000e+00 : f32
    %20 = vector.broadcast %cst_16 : f32 to vector<8x32xf32>
    %21 = arith.maximumf %19, %20 : vector<8x32xf32>
    %22 = arith.truncf %21 : vector<8x32xf32> to vector<8x32xbf16>
    %c0_17 = arith.constant 0 : index
    %c0_18 = arith.constant 0 : index
    %23 = vector.load %arg6[%c0_17, %c0_18] : memref<32x2xbf16, #tpu.memory_space<vmem>>, vector<32x2xbf16>
    %cst_19 = arith.constant dense<0.000000e+00> : vector<8x2xf32>
    %24 = tpu.matmul %22, %23, %cst_19 {dimension_numbers = #tpu.dot_dimension_numbers<[1], [0], [0], [1], [0, 0, 1, 1], [], []>} : vector<8x32xbf16>, vector<32x2xbf16>, vector<8x2xf32> -> vector<8x2xf32>
    %c0_20 = arith.constant 0 : index
    %c0_21 = arith.constant 0 : index
    %25 = vector.load %arg7[%c0_20, %c0_21] : memref<1x2xf32, #tpu.memory_space<vmem>>, vector<1x2xf32>
    %26 = vector.broadcast %25 : vector<1x2xf32> to vector<8x2xf32>
    %27 = arith.addf %24, %26 : vector<8x2xf32>
    %cst_22 = arith.constant dense<0xFF800000> : vector<8xf32>
    %28 = vector.multi_reduction <maximumf>, %27, %cst_22 [1] : vector<8x2xf32> to vector<8xf32>
    %29 = vector.shape_cast %28 : vector<8xf32> to vector<8x1xf32>
    %30 = vector.broadcast %29 : vector<8x1xf32> to vector<8x2xf32>
    %31 = arith.subf %27, %30 : vector<8x2xf32>
    %32 = math.exp %31 : vector<8x2xf32>
    %cst_23 = arith.constant dense<0.000000e+00> : vector<8xf32>
    %33 = vector.multi_reduction <add>, %32, %cst_23 [1] : vector<8x2xf32> to vector<8xf32>
    %34 = vector.shape_cast %33 : vector<8xf32> to vector<8x1xf32>
    %35 = tpu.reciprocal %34 {approx = true} : vector<8x1xf32> -> vector<8x1xf32>
    %36 = vector.broadcast %35 : vector<8x1xf32> to vector<8x2xf32>
    %37 = arith.mulf %32, %36 : vector<8x2xf32>
    %c0_24 = arith.constant 0 : index
    %c0_25 = arith.constant 0 : index
    %38 = vector.load %arg8[%c0_24, %c0_25] : memref<8x2xf32, #tpu.memory_space<vmem>>, vector<8x2xf32>
    tpu.vector_store %arg8[%c0_24, %c0_25], %37 {strides = array<i32>} : memref<8x2xf32, #tpu.memory_space<vmem>>, vector<8x2xf32>,
    return
  }
  func.func @transform_0(%arg0: i32) -> (i32, i32, i32) {
    %c0_i32 = arith.constant 0 : i32
    %c0_i32_0 = arith.constant 0 : i32
    %c0_i32_1 = arith.constant 0 : i32
    return %arg0, %c0_i32, %c0_i32_0 : i32, i32, i32
  }
  func.func @transform_1(%arg0: i32) -> (i32, i32, i32) {
    %c0_i32 = arith.constant 0 : i32
    %c0_i32_0 = arith.constant 0 : i32
    %c0_i32_1 = arith.constant 0 : i32
    %c0_i32_2 = arith.constant 0 : i32
    return %c0_i32, %c0_i32_0, %c0_i32_1 : i32, i32, i32
  }
  func.func @transform_2(%arg0: i32) -> (i32, i32) {
    %c0_i32 = arith.constant 0 : i32
    %c0_i32_0 = arith.constant 0 : i32
    %c0_i32_1 = arith.constant 0 : i32
    return %c0_i32, %c0_i32_0 : i32, i32
  }
  func.func @transform_3(%arg0: i32) -> (i32, i32) {
    %c0_i32 = arith.constant 0 : i32
    %c0_i32_0 = arith.constant 0 : i32
    %c0_i32_1 = arith.constant 0 : i32
    return %c0_i32, %c0_i32_0 : i32, i32
  }
  func.func @transform_4(%arg0: i32) -> (i32, i32) {
    %c0_i32 = arith.constant 0 : i32
    %c0_i32_0 = arith.constant 0 : i32
    %c0_i32_1 = arith.constant 0 : i32
    return %c0_i32, %c0_i32_0 : i32, i32
  }
  func.func @transform_5(%arg0: i32) -> (i32, i32) {
    %c0_i32 = arith.constant 0 : i32
    %c0_i32_0 = arith.constant 0 : i32
    %c0_i32_1 = arith.constant 0 : i32
    return %c0_i32, %c0_i32_0 : i32, i32
  }
  func.func @transform_6(%arg0: i32) -> (i32, i32) {
    %c0_i32 = arith.constant 0 : i32
    %c0_i32_0 = arith.constant 0 : i32
    %c0_i32_1 = arith.constant 0 : i32
    return %c0_i32, %c0_i32_0 : i32, i32
  }
  func.func @transform_7(%arg0: i32) -> (i32, i32) {
    %c0_i32 = arith.constant 0 : i32
    %c0_i32_0 = arith.constant 0 : i32
    return %arg0, %c0_i32 : i32, i32
  }
}

</mosaic_0001>

<bundles_post_ra>
// kernel: tpu_custom_call.1
= control target key start
LH: loop header
LB: loop body
LE: loop exit
PB: predicated region body
PF: predicated region fallthrough
CT: control target
= control target key end

     0   :  { %vm186_vm0 = vcmask 1041408   ;;  %vm46_vm1 = vsmask.f32 3328  ;;  %vm47_vm2 = vsmask.f32 7440  ;;  %vm173_vm3 = vcmask 31744   ;;  %s945_s1 = inlined_call_operand.vmem [shape: bf16[2,4,32], index: 1, kind: input, shape index: {}]   ;;  %s946_s0 = inlined_call_operand.vmem [shape: bf16[8,9,4], index: 0, kind: input, shape index: {}]   ;;  %s947_s3 = inlined_call_operand.vmem [shape: bf16[32,32], index: 3, kind: input, shape index: {}]   ;;  %s948_s5 = inlined_call_operand.vmem [shape: bf16[32,2], index: 5, kind: input, shape index: {}]   ;;  %s949_s2 = inlined_call_operand.vmem [shape: f32[1,32], index: 2, kind: input, shape index: {}]   ;;  %s950_s4 = inlined_call_operand.vmem [shape: f32[1,32], index: 4, kind: input, shape index: {}]   ;;  %s951_s6 = inlined_call_operand.vmem [shape: f32[1,2], index: 6, kind: input, shape index: {}]   ;;  %s952_s7 = inlined_call_operand.vmem [shape: f32[8,2], index: 7, kind: output, shape index: {}]  }
   0x1   :  { %v624_v0 = vld [vmem:[%s945_s1 + $0x2] sm:$0x3]  ;;  %v28_v2 = vld [vmem:[%s946_s0 + $0x4] sm:$0x1]  ;;  %v787_v4 = vld [vmem:[%s946_s0 + $0x8] sm:$0xf] }
   0x2   :  { %v777_v1 = vld [vmem:[%s946_s0] sm:$0xf]  ;;  %712 = vmatprep.subr.msk.bf16.mxu0 %vm186_vm0, %v624_v0  ;;  %v188_v3 = vsel %vm186_vm0, %v624_v0, 0  ;;  %v30_v5 = vld [vmem:[%s946_s0 + $0xc] sm:$0x1]  ;;  %713 = vmatprep.subr.msk.bf16.mxu1 %vm186_vm0, %v624_v0  ;;  %v59_v8 = vshll.u32 %v28_v2, 16  ;;  %vm823_vm4 = vmor %vm46_vm1, %vm47_vm2 }
   0x3   :  { %v50_v6 = vshrl.u32 %v777_v1, 16  ;;  %667 = vmatpush3.bf16.msra.mxu0 %v188_v3  ;;  %v53_v7 = vshll.u32 %v777_v1, 16  ;;  %v64_v9 = vshrl.u32 %v787_v4, 16  ;;  %v67_v10 = vshll.u32 %v787_v4, 16  ;;  %v43_v11 = vld [vmem:[%s945_s1] sm:$0x3]  ;;  %703 = vmatpush3.bf16.msra.mxu1 %v188_v3 }
   0x4   :  { %v73_v13 = vshll.u32 %v30_v5, 16  ;;  %714 = vmatprep.subr.msk.bf16.mxu0 %vm186_vm0, %v43_v11  ;;  %v804_v14 = vld [vmem:[%s946_s0 + $0x10] sm:$0xf]  ;;  %v32_v15 = vld [vmem:[%s946_s0 + $0x14] sm:$0x1]  ;;  %v61_v17 = vrot.slane %v59_v8, 5  ;;  %v633_v34 = vcombine.low %v777_v1, %v787_v4 }
   0x5   :  { %v52_v12 = vrot.slane %v50_v6, 4  ;;  %v55_v16 = vrot.slane %v53_v7, 5  ;;  %v66_v18 = vrot.slane %v64_v9, 4  ;;  %v69_v19 = vrot.slane %v67_v10, 5  ;;  %v812_v20 = vld [vmem:[%s946_s0 + $0x18] sm:$0xf] }
   0x6   :  { %v75_v21 = vrot.slane %v73_v13, 5  ;;  %v34_v22 = vld [vmem:[%s946_s0 + $0x1c] sm:$0x1]  ;;  %v78_v23 = vshrl.u32 %v804_v14, 16  ;;  %v81_v24 = vshll.u32 %v804_v14, 16  ;;  %v87_v25 = vshll.u32 %v32_v15, 16 }
   0x7   :  { %v56_v26 = vor.u32 %v55_v16, %v52_v12  ;;  %v70_v27 = vor.u32 %v69_v19, %v66_v18  ;;  %v92_v28 = vshrl.u32 %v812_v20, 16  ;;  %v95_v29 = vshll.u32 %v812_v20, 16  ;;  %v832_v35 = vld [vmem:[%s946_s0 + $0x20] sm:$0xf]  ;;  %v36_v40 = vld [vmem:[%s946_s0 + $0x24] sm:$0x1] }
   0x8   :  { %v80_v31 = vrot.slane %v78_v23, 4  ;;  %v83_v32 = vrot.slane %v81_v24, 5  ;;  %v101_v33 = vshll.u32 %v34_v22, 16  ;;  %v89_v42 = vrot.slane %v87_v25, 5  ;;  %v841_v45 = vld [vmem:[%s946_s0 + $0x28] sm:$0xf] }
   0x9   :  { %v57_v36 = vrot.slane %v56_v26, 4  ;;  %v71_v37 = vrot.slane %v70_v27, 4  ;;  %v94_v38 = vrot.slane %v92_v28, 4  ;;  %v97_v39 = vrot.slane %v95_v29, 5  ;;  %v38_v49 = vld [vmem:[%s946_s0 + $0x2c] sm:$0x1] }
   0xa   :  { %v84_v41 = vor.u32 %v83_v32, %v80_v31  ;;  %v103_v43 = vrot.slane %v101_v33, 5  ;;  %v288_v44 = vsel %vm186_vm0, %v43_v11, 0  ;;  %v106_v50 = vshrl.u32 %v832_v35, 16  ;;  %v39_v55 = vld [vmem:[%s946_s0 + $0x30] sm:$0xf]  ;;  %v722_v30 = vld [vmem:[%s947_s3 + $0x8] sm:$0xff]  }
   0xb   :  { %v62_v46 = vsel %vm823_vm4, %v57_v36, %v61_v17  ;;  %v76_v47 = vsel %vm823_vm4, %v71_v37, %v75_v21  ;;  %v98_v48 = vor.u32 %v97_v39, %v94_v38  ;;  %v109_v53 = vshll.u32 %v832_v35, 16  ;;  %v40_v60 = vld [vmem:[%s946_s0 + $0x34] sm:$0x1]  ;;  %v41_v1 = vld [vmem:[%s946_s0 + $0x38] sm:$0xf] }
   0xc   :  { %v625_v51 = vcombine.low %v62_v46, %v76_v47  ;;  %v85_v52 = vrot.slane %v84_v41, 4  ;;  %v115_v54 = vshll.u32 %v36_v40, 16  ;;  %v108_v57 = vrot.slane %v106_v50, 4  ;;  %v42_v5 = vld [vmem:[%s946_s0 + $0x3c] sm:$0x1] }
   0xd   :  { %v99_v56 = vrot.slane %v98_v48, 4  ;;  %v120_v58 = vshrl.u32 %v841_v45, 16  ;;  %v123_v59 = vshll.u32 %v841_v45, 16  ;;  %v111_v62 = vrot.slane %v109_v53, 5 }
   0xe   :  { %668 = vmatprep.mubr.msk.bf16.mxu0 %vm173_vm3, %v625_v51  ;;  %v90_v61 = vsel %vm823_vm4, %v85_v52, %v89_v42  ;;  %v117_v63 = vrot.slane %v115_v54, 5  ;;  %v129_v0 = vshll.u32 %v38_v49, 16  ;;  %v134_v6 = vshrl.u32 %v39_v55, 16 }
   0xf   :  { %v104_v2 = vsel %vm823_vm4, %v99_v56, %v103_v43  ;;  %v122_v3 = vrot.slane %v120_v58, 4  ;;  %v125_v4 = vrot.slane %v123_v59, 5  ;;  %v112_v8 = vor.u32 %v111_v62, %v108_v57 }
  0x10   :  { %v626_v7 = vcombine.low %v90_v61, %v104_v2  ;;  %v131_v9 = vrot.slane %v129_v0, 5  ;;  %v137_v10 = vshll.u32 %v39_v55, 16  ;;  %v136_v12 = vrot.slane %v134_v6, 4 }
  0x11   :  { %v126_v11 = vor.u32 %v125_v4, %v122_v3  ;;  %v143_v13 = vshll.u32 %v40_v60, 16  ;;  %v148_v15 = vshrl.u32 %v41_v1, 16  ;;  %v113_v16 = vrot.slane %v112_v8, 4 }
  0x12   :  { %669 = vmatmul.mubr.msk.bf16.vlgmr.msra.gmra.mrb[0].mxu0 %vm173_vm3, %v626_v7  ;;  %v139_v17 = vrot.slane %v137_v10, 5  ;;  %v151_v18 = vshll.u32 %v41_v1, 16  ;;  %v157_v19 = vshll.u32 %v42_v5, 16  ;;  %v634_v36 = vcombine.low %v804_v14, %v812_v20  ;;  %v721_v14 = vld [vmem:[%s947_s3] sm:$0xff]  }
  0x13   :  { %677 = vmatpush3.bf16.msra.mxu0 %v288_v44  ;;  %678 = vmatprep.mubr.msk.bf16.mxu0 %vm173_vm3, %v633_v34  ;;  %v127_v21 = vrot.slane %v126_v11, 4  ;;  %v150_v22 = vrot.slane %v148_v15, 4  ;;  %v118_v23 = vsel %vm823_vm4, %v113_v16, %v117_v63  ;;  %v145_v25 = vrot.slane %v143_v13, 5 }
  0x14   :  { %v140_v24 = vor.u32 %v139_v17, %v136_v12  ;;  %v153_v26 = vrot.slane %v151_v18, 5  ;;  %v159_v32 = vrot.slane %v157_v19, 5  ;;  %v635_v39 = vcombine.low %v832_v35, %v841_v45 }
  0x15   :  { %v132_v27 = vsel %vm823_vm4, %v127_v21, %v131_v9  ;;  %v636_v40 = vcombine.low %v39_v55, %v41_v1  ;;  %v729_v20 = vmov 0.0   ;;  %vm730_vm5 = vmmov 0   ;;  %v908_v9 = vld [vmem:[%s949_s2] ss:$0 sm:$0xff] }
  0x16   :  { %v627_v28 = vcombine.low %v118_v23, %v132_v27  ;;  %v141_v29 = vrot.slane %v140_v24, 4  ;;  %v154_v31 = vor.u32 %v153_v26, %v150_v22  ;;  %686 = vmatprep.subr.bf16.mxu1 %v729_v20  ;;  %vm355_vm6 = vcmask 261120  }
  0x17   :  { %vm463_vm7 = vcmask 1041409   ;;  %vm466_vm8 = vcmask 1042434   ;;  %vm469_vm9 = vcmask 1043459   ;;  %vm472_vm10 = vcmask 1044484  }
  0x18   :  { %672 = vmatprep.mubr.msk.bf16.mxu1 %vm173_vm3, %v627_v28  ;;  %v146_v33 = vsel %vm823_vm4, %v141_v29, %v145_v25  ;;  %v155_v34 = vrot.slane %v154_v31, 4  ;;  %vm475_vm11 = vcmask 1045509   ;;  %vm478_vm12 = vcmask 1046534  }
  0x19   :  { %vm481_vm13 = vcmask 1047559   ;;  %vm607_vm14 = vcmask 15360  }
  0x1a   :  { %v160_v37 = vsel %vm823_vm4, %v155_v34, %v159_v32 }
  0x1b   :  { %v628_v38 = vcombine.low %v146_v33, %v160_v37 }
  0x1d   :  { %673 = vmatmul.mubr.msk.bf16.vlgmr.msra.gmra.mrb[0].mxu1 %vm173_vm3, %v628_v38 }
  0x1e   :  { %679 = vmatmul.mubr.msk.bf16.vlgmr.msra.gmra.mrb[0].mxu0 %vm173_vm3, %v634_v36  ;;  %687 = vmatpush3.bf16.msra.mxu1 %v721_v14 }
  0x1f   :  { %682 = vmatprep.mubr.msk.bf16.mxu0 %vm173_vm3, %v635_v39  ;;  %688 = vmatprep.subr.bf16.mxu1 %v729_v20 }
  0x20   :  { %690 = vmatprep.mubr.msk.bf16.mxu1 %vm730_vm5, %v729_v20 }
  0x22   :  { %689 = vmatpush3.bf16.msra.mxu1 %v722_v30 }
  0x23   :  { %694 = vmatprep.subr.bf16.mxu1 %v729_v20 }
  0x26   :  { %683 = vmatmul.mubr.msk.bf16.gmra.mrb[4].mxu0 %vm173_vm3, %v636_v40 }
  0xf0   :  { %v674_v35 = vpop.f32.mrb[0].mxu1 }
  0xf1   :  { %v680_v41 = vpop.f32.mrb[0].mxu0  ;;  %v240_v42 = vpop.f32.mrb[1].mxu1 }
  0xf2   :  { %v370_v43 = vsel %vm355_vm6, %v680_v41, -inf  ;;  %v324_v44 = vpop.f32.mrb[1].mxu0  ;;  %v675_v45 = vpop.f32.mrb[2].mxu1 }
  0xf3   :  { %v371_v46 = vrot.slane %v370_v43, 4  ;;  %v356_v47 = vsel %vm355_vm6, %v324_v44, -inf  ;;  %v681_v48 = vpop.f32.mrb[2].mxu0  ;;  %v243_v49 = vpop.f32.mrb[3].mxu1 }
  0xf4   :  { %v357_v50 = vrot.slane %v356_v47, 4  ;;  %v377_v51 = vsel %vm355_vm6, %v681_v48, -inf  ;;  %v327_v52 = vpop.f32.mrb[3].mxu0 }
  0xf5   :  { %v372_v53 = vmax.f32 %v370_v43, %v371_v46  ;;  %v378_v54 = vrot.slane %v377_v51, 4  ;;  %v363_v55 = vsel %vm355_vm6, %v327_v52, -inf }
  0xf6   :  { %v358_v56 = vmax.f32 %v356_v47, %v357_v50  ;;  %v364_v57 = vrot.slane %v363_v55, 4 }
  0xf7   :  { %v373_v58 = vrot.slane %v372_v53, 2  ;;  %v379_v59 = vmax.f32 %v377_v51, %v378_v54 }
  0xf8   :  { %v359_v60 = vrot.slane %v358_v56, 2  ;;  %v365_v61 = vmax.f32 %v363_v55, %v364_v57 }
  0xf9   :  { %v374_v62 = vmax.f32 %v372_v53, %v373_v58  ;;  %v380_v63 = vrot.slane %v379_v59, 2  ;;  %v684_v0 = vpop.f32.mrb[4].mxu0 }
  0xfa   :  { %v360_v1 = vmax.f32 %v358_v56, %v359_v60  ;;  %v366_v2 = vrot.slane %v365_v61, 2  ;;  %v349_v3 = vadd.f32 %v684_v0, %v674_v35  ;;  %v340_v4 = vpop.f32.mrb[5].mxu0 }
  0xfb   :  { %v375_v5 = vrot.slane %v374_v62, 1  ;;  %v381_v6 = vmax.f32 %v379_v59, %v380_v63  ;;  %v341_v7 = vadd.f32 %v340_v4, %v240_v42  ;;  %v685_v8 = vpop.f32.mrb[6].mxu0 }
  0xfc   :  { %v361_v10 = vrot.slane %v360_v1, 1  ;;  %v367_v11 = vmax.f32 %v365_v61, %v366_v2  ;;  %v398_v12 = vsel %vm355_vm6, %v349_v3, -inf  ;;  %v352_v13 = vadd.f32 %v685_v8, %v675_v45  ;;  %v343_v15 = vpop.f32.mrb[7].mxu0 }
  0xfd   :  { %v376_v16 = vmax.f32 %v374_v62, %v375_v5  ;;  %v382_v17 = vrot.slane %v381_v6, 1  ;;  %v399_v18 = vrot.slane %v398_v12, 4  ;;  %v384_v19 = vsel %vm355_vm6, %v341_v7, -inf }
  0xfe   :  { %v362_v21 = vmax.f32 %v360_v1, %v361_v10  ;;  %v368_v22 = vrot.slane %v367_v11, 1  ;;  %v385_v23 = vrot.slane %v384_v19, 4  ;;  %v405_v24 = vsel %vm355_vm6, %v352_v13, -inf }
  0xff   :  { %v421_v25 = vadd.f32 %v908_v9, %v376_v16  ;;  %v383_v26 = vmax.f32 %v381_v6, %v382_v17  ;;  %v400_v27 = vmax.f32 %v398_v12, %v399_v18  ;;  %v406_v28 = vrot.slane %v405_v24, 4 }
 0x100   :  { %v419_v29 = vadd.f32 %v908_v9, %v362_v21  ;;  %v369_v31 = vmax.f32 %v367_v11, %v368_v22  ;;  %v386_v32 = vmax.f32 %v384_v19, %v385_v23  ;;  %v344_v33 = vadd.f32 %v343_v15, %v243_v49 }
 0x101   :  { %v429_v34 = vpack.c.bf16 %v421_v25, %v421_v25  ;;  %v422_v36 = vadd.f32 %v908_v9, %v383_v26  ;;  %v401_v37 = vrot.slane %v400_v27, 2  ;;  %v407_v38 = vmax.f32 %v405_v24, %v406_v28 }
 0x102   :  { %v420_v39 = vadd.f32 %v908_v9, %v369_v31  ;;  %v387_v40 = vrot.slane %v386_v32, 2  ;;  %v391_v14 = vsel %vm355_vm6, %v344_v33, -inf  ;;  %v427_v42 = vpack.c.bf16 %v419_v29, %v419_v29  ;;  %v642_v29 = vld [vmem:[%s950_s4] ss:$0 sm:$0xff] }
 0x103   :  { %v430_v30 = vpack.c.bf16 %v422_v36, %v422_v36  ;;  %v402_v35 = vmax.f32 %v400_v27, %v401_v37  ;;  %v408_v41 = vrot.slane %v407_v38, 2  ;;  %v392_v45 = vrot.slane %v391_v14, 4  ;;  %v723_v27 = vld [vmem:[%s948_s5] sm:$0xff]  }
 0x104   :  { %v428_v43 = vpack.c.bf16 %v420_v39, %v420_v39  ;;  %v388_v44 = vmax.f32 %v386_v32, %v387_v40  ;;  %v456_v46 = vunpack.c.l.b16 %v429_v34  ;;  %v454_v55 = vunpack.c.l.b16 %v427_v42 }
 0x105   :  { %v403_v47 = vrot.slane %v402_v35, 1  ;;  %v409_v48 = vmax.f32 %v407_v38, %v408_v41  ;;  %v457_v49 = vunpack.c.l.b16 %v430_v30  ;;  %v393_v52 = vmax.f32 %v391_v14, %v392_v45 }
 0x106   :  { %v455_v50 = vunpack.c.l.b16 %v428_v43  ;;  %v389_v51 = vrot.slane %v388_v44, 1  ;;  %v465_v59 = vrot.slane %v456_v46, 6 }
 0x107   :  { %v404_v53 = vmax.f32 %v402_v35, %v403_v47  ;;  %v410_v54 = vrot.slane %v409_v48, 1  ;;  %v394_v58 = vrot.slane %v393_v52, 2  ;;  %v468_v61 = vrot.slane %v457_v49, 5 }
 0x108   :  { %v462_v56 = vrot.slane %v455_v50, 7  ;;  %v390_v57 = vmax.f32 %v388_v44, %v389_v51 }
 0x109   :  { %v411_v60 = vmax.f32 %v409_v48, %v410_v54  ;;  %v395_v0 = vmax.f32 %v393_v52, %v394_v58  ;;  %v425_v2 = vadd.f32 %v908_v9, %v404_v53 }
 0x10a   :  { %v464_v62 = vsel %vm463_vm7, %v462_v56, %v454_v55  ;;  %v423_v63 = vadd.f32 %v908_v9, %v390_v57 }
 0x10b   :  { %v467_v1 = vsel %vm466_vm8, %v465_v59, %v464_v62  ;;  %v426_v5 = vadd.f32 %v908_v9, %v411_v60  ;;  %v396_v6 = vrot.slane %v395_v0, 1  ;;  %v433_v10 = vpack.c.bf16 %v425_v2, %v425_v2 }
 0x10c   :  { %v431_v3 = vpack.c.bf16 %v423_v63, %v423_v63  ;;  %v470_v4 = vsel %vm469_vm9, %v468_v61, %v467_v1 }
 0x10d   :  { %v397_v8 = vmax.f32 %v395_v0, %v396_v6  ;;  %v434_v12 = vpack.c.bf16 %v426_v5, %v426_v5  ;;  %v460_v17 = vunpack.c.l.b16 %v433_v10 }
 0x10e   :  { %v458_v7 = vunpack.c.l.b16 %v431_v3 }
 0x10f   :  { %v424_v13 = vadd.f32 %v908_v9, %v397_v8  ;;  %v461_v18 = vunpack.c.l.b16 %v434_v12  ;;  %v477_v22 = vrot.slane %v460_v17, 2  ;;  %v724_v9 = vld [vmem:[%s948_s5 + $0x8] sm:$0xff]  }
 0x110   :  { %v471_v11 = vrot.slane %v458_v7, 4 }
 0x111   :  { %v432_v16 = vpack.c.bf16 %v424_v13, %v424_v13  ;;  %v480_v23 = vrot.slane %v461_v18, 1 }
 0x112   :  { %v473_v15 = vsel %vm472_vm10, %v471_v11, %v470_v4 }
 0x113   :  { %v459_v19 = vunpack.c.l.b16 %v432_v16 }
 0x115   :  { %v474_v21 = vrot.slane %v459_v19, 3 }
 0x117   :  { %v476_v24 = vsel %vm475_vm11, %v474_v21, %v473_v15 }
 0x118   :  { %v479_v25 = vsel %vm478_vm12, %v477_v22, %v476_v24 }
 0x119   :  { %v482_v26 = vsel %vm481_vm13, %v480_v23, %v479_v25 }
 0x11a   :  { %v483_v28 = vpack.c.b16 %v482_v26, %v482_v26 }
 0x11c   :  { %691 = vmatmul.mubr.msk.bf16.vlgmr.msra.gmra.mrb[4].mxu1 %vm355_vm6, %v483_v28 }
 0x11d   :  { %695 = vmatpush3.bf16.msra.mxu1 %v723_v27  ;;  %698 = vmatprep.mubr.msk.bf16.mxu1 %vm730_vm5, %v729_v20 }
 0x11e   :  { %696 = vmatprep.subr.bf16.mxu1 %v729_v20  ;;  %v646_v20 = vld [vmem:[%s951_s6] ss:$0 sm:$0xff] }
 0x121   :  { %697 = vmatpush3.bf16.msra.mxu1 %v724_v9 }
 0x1ef   :  { %v533_v31 = vpop.f32.mrb[4].mxu1 }
 0x1f0   :  { %v534_v32 = vadd.f32 %v642_v29, %v533_v31  ;;  %v692_v33 = vpop.f32.mrb[5].mxu1 }
 0x1f1   :  { %v536_v34 = vpop.f32.mrb[6].mxu1 }
 0x1f2   :  { %v539_v36 = vmax.f32 %v534_v32, 0.0  ;;  %v693_v37 = vpop.f32.mrb[7].mxu1 }
 0x1f4   :  { %v540_v38 = vpack.c.bf16 %v539_v36, %v539_v36 }
 0x1f6   :  { %699 = vmatmul.mubr.msk.bf16.vlgmr.msra.gmra.mrb[8].mxu1 %vm355_vm6, %v540_v38 }
 0x2c9   :  { %v601_v39 = vpop.f32.mrb[8].mxu1 }
 0x2ca   :  { %v602_v40 = vadd.f32 %v646_v20, %v601_v39  ;;  %v700_v14 = vpop.f32.mrb[9].mxu1 }
 0x2cb   :  { %v604_v30 = vpop.f32.mrb[10].mxu1 }
 0x2cc   :  { %v701_v35 = vpop.f32.mrb[11].mxu1  ;;  %v608_v41 = vsel %vm607_vm14, %v602_v40, -inf }
 0x2cd   :  { %609 = vmax.xlane.f32.xlu0 %v608_v41 }
 0x35a   :  { %v610_v42 = vpop.xlane.xlu0 %609 }
 0x35b   :  { %v611_v43 = vsub.f32 %v602_v40, %v610_v42 }
 0x35d   :  { %v612_v44 = vmul.f32 1.442695, %v611_v43 }
 0x35f   :  { %725 = vpow2.f32 %v612_v44 }
 0x369   :  { %v726_v45 = vpop.eup %725 }
 0x36a   :  { %v614_v46 = vsel %vm607_vm14, %v726_v45, 0.0 }
 0x36b   :  { %615 = vadd.xlane.f32.xlu0 %v614_v46 }
 0x3f8   :  { %v616_v47 = vpop.xlane.xlu0 %615 }
 0x3f9   :  { %727 = vrcp.f32 %v616_v47 }
 0x403   :  { %v728_v48 = vpop.eup %727 }
 0x404   :  { %v618_v49 = vmul.f32 %v728_v48, %v726_v45 }
 0x406   :  { %619 = vst.msk [vmem:[%s952_s7] sm:$0xff] %vm607_vm14, %v618_v49 }

// kernel: tpu_custom_call.1
= control target key start
LH: loop header
LB: loop body
LE: loop exit
PB: predicated region body
PF: predicated region fallthrough
CT: control target
= control target key end

     0   :  { %vm186_vm0 = vcmask 1041408   ;;  %vm46_vm1 = vsmask.f32 3328  ;;  %vm47_vm2 = vsmask.f32 7440  ;;  %vm173_vm3 = vcmask 31744   ;;  %s945_s1 = inlined_call_operand.vmem [shape: bf16[2,4,32], index: 1, kind: input, shape index: {}]   ;;  %s946_s0 = inlined_call_operand.vmem [shape: bf16[8,9,4], index: 0, kind: input, shape index: {}]   ;;  %s947_s3 = inlined_call_operand.vmem [shape: bf16[32,32], index: 3, kind: input, shape index: {}]   ;;  %s948_s5 = inlined_call_operand.vmem [shape: bf16[32,2], index: 5, kind: input, shape index: {}]   ;;  %s949_s2 = inlined_call_operand.vmem [shape: f32[1,32], index: 2, kind: input, shape index: {}]   ;;  %s950_s4 = inlined_call_operand.vmem [shape: f32[1,32], index: 4, kind: input, shape index: {}]   ;;  %s951_s6 = inlined_call_operand.vmem [shape: f32[1,2], index: 6, kind: input, shape index: {}]   ;;  %s952_s7 = inlined_call_operand.vmem [shape: f32[8,2], index: 7, kind: output, shape index: {}]  }
   0x1   :  { %v624_v0 = vld [vmem:[%s945_s1 + $0x2] sm:$0x3]  ;;  %v28_v2 = vld [vmem:[%s946_s0 + $0x4] sm:$0x1]  ;;  %v787_v4 = vld [vmem:[%s946_s0 + $0x8] sm:$0xf] }
   0x2   :  { %v777_v1 = vld [vmem:[%s946_s0] sm:$0xf]  ;;  %712 = vmatprep.subr.msk.bf16.mxu0 %vm186_vm0, %v624_v0  ;;  %v188_v3 = vsel %vm186_vm0, %v624_v0, 0  ;;  %v30_v5 = vld [vmem:[%s946_s0 + $0xc] sm:$0x1]  ;;  %713 = vmatprep.subr.msk.bf16.mxu1 %vm186_vm0, %v624_v0  ;;  %v59_v8 = vshll.u32 %v28_v2, 16  ;;  %vm823_vm4 = vmor %vm46_vm1, %vm47_vm2 }
   0x3   :  { %v50_v6 = vshrl.u32 %v777_v1, 16  ;;  %667 = vmatpush3.bf16.msra.mxu0 %v188_v3  ;;  %v53_v7 = vshll.u32 %v777_v1, 16  ;;  %v64_v9 = vshrl.u32 %v787_v4, 16  ;;  %v67_v10 = vshll.u32 %v787_v4, 16  ;;  %v43_v11 = vld [vmem:[%s945_s1] sm:$0x3]  ;;  %703 = vmatpush3.bf16.msra.mxu1 %v188_v3 }
   0x4   :  { %v73_v13 = vshll.u32 %v30_v5, 16  ;;  %714 = vmatprep.subr.msk.bf16.mxu0 %vm186_vm0, %v43_v11  ;;  %v804_v14 = vld [vmem:[%s946_s0 + $0x10] sm:$0xf]  ;;  %v32_v15 = vld [vmem:[%s946_s0 + $0x14] sm:$0x1]  ;;  %v61_v17 = vrot.slane %v59_v8, 5  ;;  %v633_v34 = vcombine.low %v777_v1, %v787_v4 }
   0x5   :  { %v52_v12 = vrot.slane %v50_v6, 4  ;;  %v55_v16 = vrot.slane %v53_v7, 5  ;;  %v66_v18 = vrot.slane %v64_v9, 4  ;;  %v69_v19 = vrot.slane %v67_v10, 5  ;;  %v812_v20 = vld [vmem:[%s946_s0 + $0x18] sm:$0xf] }
   0x6   :  { %v75_v21 = vrot.slane %v73_v13, 5  ;;  %v34_v22 = vld [vmem:[%s946_s0 + $0x1c] sm:$0x1]  ;;  %v78_v23 = vshrl.u32 %v804_v14, 16  ;;  %v81_v24 = vshll.u32 %v804_v14, 16  ;;  %v87_v25 = vshll.u32 %v32_v15, 16 }
   0x7   :  { %v56_v26 = vor.u32 %v55_v16, %v52_v12  ;;  %v70_v27 = vor.u32 %v69_v19, %v66_v18  ;;  %v92_v28 = vshrl.u32 %v812_v20, 16  ;;  %v95_v29 = vshll.u32 %v812_v20, 16  ;;  %v832_v35 = vld [vmem:[%s946_s0 + $0x20] sm:$0xf]  ;;  %v36_v40 = vld [vmem:[%s946_s0 + $0x24] sm:$0x1] }
   0x8   :  { %v80_v31 = vrot.slane %v78_v23, 4  ;;  %v83_v32 = vrot.slane %v81_v24, 5  ;;  %v101_v33 = vshll.u32 %v34_v22, 16  ;;  %v89_v42 = vrot.slane %v87_v25, 5  ;;  %v841_v45 = vld [vmem:[%s946_s0 + $0x28] sm:$0xf] }
   0x9   :  { %v57_v36 = vrot.slane %v56_v26, 4  ;;  %v71_v37 = vrot.slane %v70_v27, 4  ;;  %v94_v38 = vrot.slane %v92_v28, 4  ;;  %v97_v39 = vrot.slane %v95_v29, 5  ;;  %v38_v49 = vld [vmem:[%s946_s0 + $0x2c] sm:$0x1] }
   0xa   :  { %v84_v41 = vor.u32 %v83_v32, %v80_v31  ;;  %v103_v43 = vrot.slane %v101_v33, 5  ;;  %v288_v44 = vsel %vm186_vm0, %v43_v11, 0  ;;  %v106_v50 = vshrl.u32 %v832_v35, 16  ;;  %v39_v55 = vld [vmem:[%s946_s0 + $0x30] sm:$0xf]  ;;  %v722_v30 = vld [vmem:[%s947_s3 + $0x8] sm:$0xff]  }
   0xb   :  { %v62_v46 = vsel %vm823_vm4, %v57_v36, %v61_v17  ;;  %v76_v47 = vsel %vm823_vm4, %v71_v37, %v75_v21  ;;  %v98_v48 = vor.u32 %v97_v39, %v94_v38  ;;  %v109_v53 = vshll.u32 %v832_v35, 16  ;;  %v40_v60 = vld [vmem:[%s946_s0 + $0x34] sm:$0x1]  ;;  %v41_v1 = vld [vmem:[%s946_s0 + $0x38] sm:$0xf] }
   0xc   :  { %v625_v51 = vcombine.low %v62_v46, %v76_v47  ;;  %v85_v52 = vrot.slane %v84_v41, 4  ;;  %v115_v54 = vshll.u32 %v36_v40, 16  ;;  %v108_v57 = vrot.slane %v106_v50, 4  ;;  %v42_v5 = vld [vmem:[%s946_s0 + $0x3c] sm:$0x1] }
   0xd   :  { %v99_v56 = vrot.slane %v98_v48, 4  ;;  %v120_v58 = vshrl.u32 %v841_v45, 16  ;;  %v123_v59 = vshll.u32 %v841_v45, 16  ;;  %v111_v62 = vrot.slane %v109_v53, 5 }
   0xe   :  { %668 = vmatprep.mubr.msk.bf16.mxu0 %vm173_vm3, %v625_v51  ;;  %v90_v61 = vsel %vm823_vm4, %v85_v52, %v89_v42  ;;  %v117_v63 = vrot.slane %v115_v54, 5  ;;  %v129_v0 = vshll.u32 %v38_v49, 16  ;;  %v134_v6 = vshrl.u32 %v39_v55, 16 }
   0xf   :  { %v104_v2 = vsel %vm823_vm4, %v99_v56, %v103_v43  ;;  %v122_v3 = vrot.slane %v120_v58, 4  ;;  %v125_v4 = vrot.slane %v123_v59, 5  ;;  %v112_v8 = vor.u32 %v111_v62, %v108_v57 }
  0x10   :  { %v626_v7 = vcombine.low %v90_v61, %v104_v2  ;;  %v131_v9 = vrot.slane %v129_v0, 5  ;;  %v137_v10 = vshll.u32 %v39_v55, 16  ;;  %v136_v12 = vrot.slane %v134_v6, 4 }
  0x11   :  { %v126_v11 = vor.u32 %v125_v4, %v122_v3  ;;  %v143_v13 = vshll.u32 %v40_v60, 16  ;;  %v148_v15 = vshrl.u32 %v41_v1, 16  ;;  %v113_v16 = vrot.slane %v112_v8, 4 }
  0x12   :  { %669 = vmatmul.mubr.msk.bf16.vlgmr.msra.gmra.mrb[0].mxu0 %vm173_vm3, %v626_v7  ;;  %v139_v17 = vrot.slane %v137_v10, 5  ;;  %v151_v18 = vshll.u32 %v41_v1, 16  ;;  %v157_v19 = vshll.u32 %v42_v5, 16  ;;  %v634_v36 = vcombine.low %v804_v14, %v812_v20  ;;  %v721_v14 = vld [vmem:[%s947_s3] sm:$0xff]  }
  0x13   :  { %677 = vmatpush3.bf16.msra.mxu0 %v288_v44  ;;  %678 = vmatprep.mubr.msk.bf16.mxu0 %vm173_vm3, %v633_v34  ;;  %v127_v21 = vrot.slane %v126_v11, 4  ;;  %v150_v22 = vrot.slane %v148_v15, 4  ;;  %v118_v23 = vsel %vm823_vm4, %v113_v16, %v117_v63  ;;  %v145_v25 = vrot.slane %v143_v13, 5 }
  0x14   :  { %v140_v24 = vor.u32 %v139_v17, %v136_v12  ;;  %v153_v26 = vrot.slane %v151_v18, 5  ;;  %v159_v32 = vrot.slane %v157_v19, 5  ;;  %v635_v39 = vcombine.low %v832_v35, %v841_v45 }
  0x15   :  { %v132_v27 = vsel %vm823_vm4, %v127_v21, %v131_v9  ;;  %v636_v40 = vcombine.low %v39_v55, %v41_v1  ;;  %v729_v20 = vmov 0.0   ;;  %vm730_vm5 = vmmov 0   ;;  %v908_v9 = vld [vmem:[%s949_s2] ss:$0 sm:$0xff] }
  0x16   :  { %v627_v28 = vcombine.low %v118_v23, %v132_v27  ;;  %v141_v29 = vrot.slane %v140_v24, 4  ;;  %v154_v31 = vor.u32 %v153_v26, %v150_v22  ;;  %686 = vmatprep.subr.bf16.mxu1 %v729_v20  ;;  %vm355_vm6 = vcmask 261120  }
  0x17   :  { %vm463_vm7 = vcmask 1041409   ;;  %vm466_vm8 = vcmask 1042434   ;;  %vm469_vm9 = vcmask 1043459   ;;  %vm472_vm10 = vcmask 1044484  }
  0x18   :  { %672 = vmatprep.mubr.msk.bf16.mxu1 %vm173_vm3, %v627_v28  ;;  %v146_v33 = vsel %vm823_vm4, %v141_v29, %v145_v25  ;;  %v155_v34 = vrot.slane %v154_v31, 4  ;;  %vm475_vm11 = vcmask 1045509   ;;  %vm478_vm12 = vcmask 1046534  }
  0x19   :  { %vm481_vm13 = vcmask 1047559   ;;  %vm607_vm14 = vcmask 15360  }
  0x1a   :  { %v160_v37 = vsel %vm823_vm4, %v155_v34, %v159_v32 }
  0x1b   :  { %v628_v38 = vcombine.low %v146_v33, %v160_v37 }
  0x1d   :  { %673 = vmatmul.mubr.msk.bf16.vlgmr.msra.gmra.mrb[0].mxu1 %vm173_vm3, %v628_v38 }
  0x1e   :  { %679 = vmatmul.mubr.msk.bf16.vlgmr.msra.gmra.mrb[0].mxu0 %vm173_vm3, %v634_v36  ;;  %687 = vmatpush3.bf16.msra.mxu1 %v721_v14 }
  0x1f   :  { %682 = vmatprep.mubr.msk.bf16.mxu0 %vm173_vm3, %v635_v39  ;;  %688 = vmatprep.subr.bf16.mxu1 %v729_v20 }
  0x20   :  { %690 = vmatprep.mubr.msk.bf16.mxu1 %vm730_vm5, %v729_v20 }
  0x22   :  { %689 = vmatpush3.bf16.msra.mxu1 %v722_v30 }
  0x23   :  { %694 = vmatprep.subr.bf16.mxu1 %v729_v20 }
  0x26   :  { %683 = vmatmul.mubr.msk.bf16.gmra.mrb[4].mxu0 %vm173_vm3, %v636_v40 }
  0xf0   :  { %v674_v35 = vpop.f32.mrb[0].mxu1 }
  0xf1   :  { %v680_v41 = vpop.f32.mrb[0].mxu0  ;;  %v240_v42 = vpop.f32.mrb[1].mxu1 }
  0xf2   :  { %v370_v43 = vsel %vm355_vm6, %v680_v41, -inf  ;;  %v324_v44 = vpop.f32.mrb[1].mxu0  ;;  %v675_v45 = vpop.f32.mrb[2].mxu1 }
  0xf3   :  { %v371_v46 = vrot.slane %v370_v43, 4  ;;  %v356_v47 = vsel %vm355_vm6, %v324_v44, -inf  ;;  %v681_v48 = vpop.f32.mrb[2].mxu0  ;;  %v243_v49 = vpop.f32.mrb[3].mxu1 }
  0xf4   :  { %v357_v50 = vrot.slane %v356_v47, 4  ;;  %v377_v51 = vsel %vm355_vm6, %v681_v48, -inf  ;;  %v327_v52 = vpop.f32.mrb[3].mxu0 }
  0xf5   :  { %v372_v53 = vmax.f32 %v370_v43, %v371_v46  ;;  %v378_v54 = vrot.slane %v377_v51, 4  ;;  %v363_v55 = vsel %vm355_vm6, %v327_v52, -inf }
  0xf6   :  { %v358_v56 = vmax.f32 %v356_v47, %v357_v50  ;;  %v364_v57 = vrot.slane %v363_v55, 4 }
  0xf7   :  { %v373_v58 = vrot.slane %v372_v53, 2  ;;  %v379_v59 = vmax.f32 %v377_v51, %v378_v54 }
  0xf8   :  { %v359_v60 = vrot.slane %v358_v56, 2  ;;  %v365_v61 = vmax.f32 %v363_v55, %v364_v57 }
  0xf9   :  { %v374_v62 = vmax.f32 %v372_v53, %v373_v58  ;;  %v380_v63 = vrot.slane %v379_v59, 2  ;;  %v684_v0 = vpop.f32.mrb[4].mxu0 }
  0xfa   :  { %v360_v1 = vmax.f32 %v358_v56, %v359_v60  ;;  %v366_v2 = vrot.slane %v365_v61, 2  ;;  %v349_v3 = vadd.f32 %v684_v0, %v674_v35  ;;  %v340_v4 = vpop.f32.mrb[5].mxu0 }
  0xfb   :  { %v375_v5 = vrot.slane %v374_v62, 1  ;;  %v381_v6 = vmax.f32 %v379_v59, %v380_v63  ;;  %v341_v7 = vadd.f32 %v340_v4, %v240_v42  ;;  %v685_v8 = vpop.f32.mrb[6].mxu0 }
  0xfc   :  { %v361_v10 = vrot.slane %v360_v1, 1  ;;  %v367_v11 = vmax.f32 %v365_v61, %v366_v2  ;;  %v398_v12 = vsel %vm355_vm6, %v349_v3, -inf  ;;  %v352_v13 = vadd.f32 %v685_v8, %v675_v45  ;;  %v343_v15 = vpop.f32.mrb[7].mxu0 }
  0xfd   :  { %v376_v16 = vmax.f32 %v374_v62, %v375_v5  ;;  %v382_v17 = vrot.slane %v381_v6, 1  ;;  %v399_v18 = vrot.slane %v398_v12, 4  ;;  %v384_v19 = vsel %vm355_vm6, %v341_v7, -inf }
  0xfe   :  { %v362_v21 = vmax.f32 %v360_v1, %v361_v10  ;;  %v368_v22 = vrot.slane %v367_v11, 1  ;;  %v385_v23 = vrot.slane %v384_v19, 4  ;;  %v405_v24 = vsel %vm355_vm6, %v352_v13, -inf }
  0xff   :  { %v421_v25 = vadd.f32 %v908_v9, %v376_v16  ;;  %v383_v26 = vmax.f32 %v381_v6, %v382_v17  ;;  %v400_v27 = vmax.f32 %v398_v12, %v399_v18  ;;  %v406_v28 = vrot.slane %v405_v24, 4 }
 0x100   :  { %v419_v29 = vadd.f32 %v908_v9, %v362_v21  ;;  %v369_v31 = vmax.f32 %v367_v11, %v368_v22  ;;  %v386_v32 = vmax.f32 %v384_v19, %v385_v23  ;;  %v344_v33 = vadd.f32 %v343_v15, %v243_v49 }
 0x101   :  { %v429_v34 = vpack.c.bf16 %v421_v25, %v421_v25  ;;  %v422_v36 = vadd.f32 %v908_v9, %v383_v26  ;;  %v401_v37 = vrot.slane %v400_v27, 2  ;;  %v407_v38 = vmax.f32 %v405_v24, %v406_v28 }
 0x102   :  { %v420_v39 = vadd.f32 %v908_v9, %v369_v31  ;;  %v387_v40 = vrot.slane %v386_v32, 2  ;;  %v391_v14 = vsel %vm355_vm6, %v344_v33, -inf  ;;  %v427_v42 = vpack.c.bf16 %v419_v29, %v419_v29  ;;  %v642_v29 = vld [vmem:[%s950_s4] ss:$0 sm:$0xff] }
 0x103   :  { %v430_v30 = vpack.c.bf16 %v422_v36, %v422_v36  ;;  %v402_v35 = vmax.f32 %v400_v27, %v401_v37  ;;  %v408_v41 = vrot.slane %v407_v38, 2  ;;  %v392_v45 = vrot.slane %v391_v14, 4  ;;  %v723_v27 = vld [vmem:[%s948_s5] sm:$0xff]  }
 0x104   :  { %v428_v43 = vpack.c.bf16 %v420_v39, %v420_v39  ;;  %v388_v44 = vmax.f32 %v386_v32, %v387_v40  ;;  %v456_v46 = vunpack.c.l.b16 %v429_v34  ;;  %v454_v55 = vunpack.c.l.b16 %v427_v42 }
 0x105   :  { %v403_v47 = vrot.slane %v402_v35, 1  ;;  %v409_v48 = vmax.f32 %v407_v38, %v408_v41  ;;  %v457_v49 = vunpack.c.l.b16 %v430_v30  ;;  %v393_v52 = vmax.f32 %v391_v14, %v392_v45 }
 0x106   :  { %v455_v50 = vunpack.c.l.b16 %v428_v43  ;;  %v389_v51 = vrot.slane %v388_v44, 1  ;;  %v465_v59 = vrot.slane %v456_v46, 6 }
 0x107   :  { %v404_v53 = vmax.f32 %v402_v35, %v403_v47  ;;  %v410_v54 = vrot.slane %v409_v48, 1  ;;  %v394_v58 = vrot.slane %v393_v52, 2  ;;  %v468_v61 = vrot.slane %v457_v49, 5 }
 0x108   :  { %v462_v56 = vrot.slane %v455_v50, 7  ;;  %v390_v57 = vmax.f32 %v388_v44, %v389_v51 }
 0x109   :  { %v411_v60 = vmax.f32 %v409_v48, %v410_v54  ;;  %v395_v0 = vmax.f32 %v393_v52, %v394_v58  ;;  %v425_v2 = vadd.f32 %v908_v9, %v404_v53 }
 0x10a   :  { %v464_v62 = vsel %vm463_vm7, %v462_v56, %v454_v55  ;;  %v423_v63 = vadd.f32 %v908_v9, %v390_v57 }
 0x10b   :  { %v467_v1 = vsel %vm466_vm8, %v465_v59, %v464_v62  ;;  %v426_v5 = vadd.f32 %v908_v9, %v411_v60  ;;  %v396_v6 = vrot.slane %v395_v0, 1  ;;  %v433_v10 = vpack.c.bf16 %v425_v2, %v425_v2 }
 0x10c   :  { %v431_v3 = vpack.c.bf16 %v423_v63, %v423_v63  ;;  %v470_v4 = vsel %vm469_vm9, %v468_v61, %v467_v1 }
 0x10d   :  { %v397_v8 = vmax.f32 %v395_v0, %v396_v6  ;;  %v434_v12 = vpack.c.bf16 %v426_v5, %v426_v5  ;;  %v460_v17 = vunpack.c.l.b16 %v433_v10 }
 0x10e   :  { %v458_v7 = vunpack.c.l.b16 %v431_v3 }
 0x10f   :  { %v424_v13 = vadd.f32 %v908_v9, %v397_v8  ;;  %v461_v18 = vunpack.c.l.b16 %v434_v12  ;;  %v477_v22 = vrot.slane %v460_v17, 2  ;;  %v724_v9 = vld [vmem:[%s948_s5 + $0x8] sm:$0xff]  }
 0x110   :  { %v471_v11 = vrot.slane %v458_v7, 4 }
 0x111   :  { %v432_v16 = vpack.c.bf16 %v424_v13, %v424_v13  ;;  %v480_v23 = vrot.slane %v461_v18, 1 }
 0x112   :  { %v473_v15 = vsel %vm472_vm10, %v471_v11, %v470_v4 }
 0x113   :  { %v459_v19 = vunpack.c.l.b16 %v432_v16 }
 0x115   :  { %v474_v21 = vrot.slane %v459_v19, 3 }
 0x117   :  { %v476_v24 = vsel %vm475_vm11, %v474_v21, %v473_v15 }
 0x118   :  { %v479_v25 = vsel %vm478_vm12, %v477_v22, %v476_v24 }
 0x119   :  { %v482_v26 = vsel %vm481_vm13, %v480_v23, %v479_v25 }
 0x11a   :  { %v483_v28 = vpack.c.b16 %v482_v26, %v482_v26 }
 0x11c   :  { %691 = vmatmul.mubr.msk.bf16.vlgmr.msra.gmra.mrb[4].mxu1 %vm355_vm6, %v483_v28 }
 0x11d   :  { %695 = vmatpush3.bf16.msra.mxu1 %v723_v27  ;;  %698 = vmatprep.mubr.msk.bf16.mxu1 %vm730_vm5, %v729_v20 }
 0x11e   :  { %696 = vmatprep.subr.bf16.mxu1 %v729_v20  ;;  %v646_v20 = vld [vmem:[%s951_s6] ss:$0 sm:$0xff] }
 0x121   :  { %697 = vmatpush3.bf16.msra.mxu1 %v724_v9 }
 0x1ef   :  { %v533_v31 = vpop.f32.mrb[4].mxu1 }
 0x1f0   :  { %v534_v32 = vadd.f32 %v642_v29, %v533_v31  ;;  %v692_v33 = vpop.f32.mrb[5].mxu1 }
 0x1f1   :  { %v536_v34 = vpop.f32.mrb[6].mxu1 }
 0x1f2   :  { %v539_v36 = vmax.f32 %v534_v32, 0.0  ;;  %v693_v37 = vpop.f32.mrb[7].mxu1 }
 0x1f4   :  { %v540_v38 = vpack.c.bf16 %v539_v36, %v539_v36 }
 0x1f6   :  { %699 = vmatmul.mubr.msk.bf16.vlgmr.msra.gmra.mrb[8].mxu1 %vm355_vm6, %v540_v38 }
 0x2c9   :  { %v601_v39 = vpop.f32.mrb[8].mxu1 }
 0x2ca   :  { %v602_v40 = vadd.f32 %v646_v20, %v601_v39  ;;  %v700_v14 = vpop.f32.mrb[9].mxu1 }
 0x2cb   :  { %v604_v30 = vpop.f32.mrb[10].mxu1 }
 0x2cc   :  { %v701_v35 = vpop.f32.mrb[11].mxu1  ;;  %v608_v41 = vsel %vm607_vm14, %v602_v40, -inf }
 0x2cd   :  { %609 = vmax.xlane.f32.xlu0 %v608_v41 }
 0x35a   :  { %v610_v42 = vpop.xlane.xlu0 %609 }
 0x35b   :  { %v611_v43 = vsub.f32 %v602_v40, %v610_v42 }
 0x35d   :  { %v612_v44 = vmul.f32 1.442695, %v611_v43 }
 0x35f   :  { %725 = vpow2.f32 %v612_v44 }
 0x369   :  { %v726_v45 = vpop.eup %725 }
 0x36a   :  { %v614_v46 = vsel %vm607_vm14, %v726_v45, 0.0 }
 0x36b   :  { %615 = vadd.xlane.f32.xlu0 %v614_v46 }
 0x3f8   :  { %v616_v47 = vpop.xlane.xlu0 %615 }
 0x3f9   :  { %727 = vrcp.f32 %v616_v47 }
 0x403   :  { %v728_v48 = vpop.eup %727 }
 0x404   :  { %v618_v49 = vmul.f32 %v728_v48, %v726_v45 }
 0x406   :  { %619 = vst.msk [vmem:[%s952_s7] sm:$0xff] %vm607_vm14, %v618_v49 }

</bundles_post_ra>
